<compile_context>
chip_gen: v7x
topology: tpu7x:2x2x1
jax: 0.10.0
libtpu: 0.0.40
codegen_flags: <defaults>
</compile_context>

<pallas_src>
import math

import jax
import jax.numpy as jnp
from jax.experimental import pallas as pl
from jax.experimental.pallas import tpu as pltpu


# ----------------------------------------------------------------------------
# Funnel geometry (mirrors the PyTorch constructor)
# ----------------------------------------------------------------------------
def _funnel_layer_nodes(input_dim: int, output_dim: int, n_layers: int):
    transition_step = (input_dim - output_dim) // n_layers
    remainder = (input_dim - output_dim) % n_layers
    start = input_dim - (transition_step + remainder)
    n_f = lambda i: start - transition_step * i
    return [input_dim, *(n_f(i) for i in range(n_layers - 1))]


# ----------------------------------------------------------------------------
# Parameter init (PyTorch defaults)
# ----------------------------------------------------------------------------
def init_params(key, input_dim, output_dim, n_layers=3, dtype=jnp.float32):
    """List of layer dicts: {"w": (in,out) [= W^T], "b": (out,), "bn": {...} or None}."""
    layer_nodes = _funnel_layer_nodes(input_dim, output_dim, n_layers)
    dims = list(zip(layer_nodes[:-1], layer_nodes[1:])) + [(layer_nodes[-1], output_dim)]
    layers = []
    for li, (fan_in, fan_out) in enumerate(dims):
        key, kw, kb = jax.random.split(key, 3)
        bound = 1.0 / math.sqrt(fan_in)
        w = jax.random.uniform(kw, (fan_in, fan_out), dtype, -bound, bound)  # W^T
        b = jax.random.uniform(kb, (fan_out,), dtype, -bound, bound)
        bn = None
        if li < len(dims) - 1:
            # PyTorch BatchNorm1d init: gamma=1, beta=0, running_mean=0, running_var=1
            bn = dict(
                gamma=jnp.ones((fan_out,), dtype),
                beta=jnp.zeros((fan_out,), dtype),
                mean=jnp.zeros((fan_out,), dtype),
                var=jnp.ones((fan_out,), dtype),
            )
        layers.append(dict(w=w, b=b, bn=bn))
    return layers


# ----------------------------------------------------------------------------
# One-time weight preparation: BN folding + pack-way block-diagonal expansion
# (hoisted out of the per-call forward path; call once and reuse).
# ----------------------------------------------------------------------------
def prepare_packed_params(layers, *, pack=None, eps=1e-5, param_dtype=jnp.float32):
    in_dim = layers[0]["w"].shape[0]
    if pack is None:
        # Layer-1 contraction K = pack*in_dim ~= 128 (fills v5e MXU depth,
        # stays <=256 for v6e/v7x).
        pack = max(1, 128 // in_dim)
    packed = []
    for layer in layers:
        w = layer["w"].astype(jnp.float32)
        b = layer["b"].astype(jnp.float32)
        bn = layer["bn"]
        if bn is not None:
            scale = bn["gamma"].astype(jnp.float32) / jnp.sqrt(
                bn["var"].astype(jnp.float32) + eps)
            shift = bn["beta"].astype(jnp.float32) - bn["mean"].astype(jnp.float32) * scale
            w = w * scale[None, :]          # column-wise (output-feature) scale
            b = b * scale + shift
        if pack > 1:
            k, n = w.shape
            wp = jnp.zeros((pack * k, pack * n), jnp.float32)
            for p in range(pack):
                wp = wp.at[p * k:(p + 1) * k, p * n:(p + 1) * n].set(w)
            w = wp
            b = jnp.tile(b, pack)
        packed.append((w.astype(param_dtype), b.reshape(1, -1).astype(jnp.float32)))
    return pack, packed


# ----------------------------------------------------------------------------
# Pallas kernel: chain of [matmul + bias (+ ReLU)] on packed tiles
# ----------------------------------------------------------------------------
def make_funnel_kernel(n_linear: int):
    def kernel(*refs):
        x_ref, out_ref = refs[0], refs[-1]
        params = refs[1:-1]
        h = x_ref[...]
        for li in range(n_linear):
            w_ref = params[2 * li]
            b_ref = params[2 * li + 1]
            # Cast the tile (already in VMEM) to the weight dtype; f32 accumulate.
            h = jnp.dot(h.astype(w_ref.dtype), w_ref[...],
                        preferred_element_type=jnp.float32) + b_ref[...]
            if li < n_linear - 1:
                h = jnp.maximum(h, 0.0)      # ReLU (Dropout = identity at eval)
        out_ref[...] = h.astype(out_ref.dtype)
    return kernel


def _param_spec(shape):
    """Full-array, grid-invariant block: parameter stays resident in VMEM."""
    rank = len(shape)
    return pl.BlockSpec(shape, lambda i, _r=rank: (0,) * _r)


def _choose_batch_tile(rows_p, requested):
    if requested is None:
        requested = 1024                    # 1024 packed rows = pack*1024 original rows
    if rows_p <= requested:
        # One (possibly ragged) step covering everything.
        return rows_p if (rows_p < 8 or rows_p % 8 == 0) else ((rows_p + 7) // 8) * 8
    return max(8, (requested // 8) * 8)     # multiple of 8 for sublane alignment


def _dense_chain(h, packed_params):
    n_lin = len(packed_params)
    for li, (w, b) in enumerate(packed_params):
        h = jnp.dot(h.astype(w.dtype), w, preferred_element_type=jnp.float32) + b
        if li < n_lin - 1:
            h = jnp.maximum(h, 0.0)
    return h


# ----------------------------------------------------------------------------
# Forward wrapper
# ----------------------------------------------------------------------------
def linear_funnel_forward(x, packed_params, output_dim, *, pack, batch_tile=None,
                          use_pallas=None):
    """x: (B, input_dim) in its stored dtype (f32 or bf16 — no wrapper cast).
    packed_params: output of prepare_packed_params (folded + block-diag)."""
    B, in_dim = x.shape
    n_linear = len(packed_params)

    # Make B divisible by the pack factor (pads at most pack-1 rows).
    pad = (-B) % pack
    if pad:
        x = jnp.pad(x, ((0, pad), (0, 0)))
    rows_p = (B + pad) // pack
    kp = pack * in_dim
    np_out = pack * output_dim
    xp = x.reshape(rows_p, kp)               # free row-major view (bitcast)

    if use_pallas is None:
        use_pallas = B >= 512                # below that, launch/DMA latency dominates

    if use_pallas:
        tile = _choose_batch_tile(rows_p, batch_tile)
        grid = (pl.cdiv(rows_p, tile),)      # ragged last block; no batch padding
        flat_params = [a for wb in packed_params for a in wb]
        in_specs = [pl.BlockSpec((tile, kp), lambda i: (i, 0))]
        in_specs += [_param_spec(p.shape) for p in flat_params]
        # Output last dim = pack*output_dim (32 here): still <128 lanes but 4x
        # denser stores than unpacked; accepted per review (padding to 128 would
        # multiply writeback bytes).
        out_specs = pl.BlockSpec((tile, np_out), lambda i: (i, 0))

        out_p = pl.pallas_call(
            make_funnel_kernel(n_linear),
            out_shape=jax.ShapeDtypeStruct((rows_p, np_out), x.dtype),
            grid=grid,
            in_specs=in_specs,
            out_specs=out_specs,
            compiler_params=pltpu.CompilerParams(
                dimension_semantics=("parallel",),
                vmem_limit_bytes=32 * 1024 * 1024,
            ),
        )(xp, *flat_params)
    else:
        out_p = _dense_chain(xp, packed_params).astype(x.dtype)

    out = out_p.reshape(rows_p * pack, output_dim)
    return out[:B] if pad else out


# ----------------------------------------------------------------------------
# Pure-JAX reference (explicit BN math) — validates folding + packing
# ----------------------------------------------------------------------------
def reference_forward(x, layers, eps=1e-5):
    h = x.astype(jnp.float32)
    for layer in layers:
        h = h @ layer["w"].astype(jnp.float32) + layer["b"].astype(jnp.float32)
        bn = layer["bn"]
        if bn is not None:
            h = (h - bn["mean"]) / jnp.sqrt(bn["var"] + eps) * bn["gamma"] + bn["beta"]
            h = jnp.maximum(h, 0.0)
    return h


if __name__ == "__main__":
    input_dim, output_dim, n_layers = 32, 8, 3

    key = jax.random.PRNGKey(0)
    key, kx = jax.random.split(key)
    layers = init_params(key, input_dim, output_dim, n_layers)

    # Hoisted one-time prep: BN folding + 4-way block-diagonal packing.
    pack, packed_params = prepare_packed_params(layers)
    assert pack == 4

    # --- test 1: f32, batch divisible by pack, single grid step ----------------
    batch = 64
    x = jax.random.normal(kx, (batch, input_dim), jnp.float32)
    ref = reference_forward(x, layers)
    out = linear_funnel_forward(x, packed_params, output_dim, pack=pack,
                                use_pallas=True)
    out = jax.block_until_ready(out)
    assert out.shape == (batch, output_dim)
    assert jnp.allclose(out, ref, atol=1e-4, rtol=1e-4), "f32 mismatch vs reference"

    # --- test 2: ragged grid (B not divisible by pack, multi-step tiles) -------
    key, kx2 = jax.random.split(key)
    batch2 = 50
    x2 = jax.random.normal(kx2, (batch2, input_dim), jnp.float32)
    ref2 = reference_forward(x2, layers)
    out2 = linear_funnel_forward(x2, packed_params, output_dim, pack=pack,
                                 batch_tile=8, use_pallas=True)
    out2 = jax.block_until_ready(out2)
    assert out2.shape == (batch2, output_dim)
    assert jnp.allclose(out2, ref2, atol=1e-4, rtol=1e-4), "ragged-grid mismatch"

    # --- test 3: bf16 input read in its stored dtype (no wrapper cast) ---------
    x_bf16 = x.astype(jnp.bfloat16)
    out_bf = linear_funnel_forward(x_bf16, packed_params, output_dim, pack=pack,
                                   use_pallas=True)
    out_bf = jax.block_until_ready(out_bf)
    ref_bf = reference_forward(x_bf16.astype(jnp.float32), layers)
    assert jnp.allclose(out_bf.astype(jnp.float32), ref_bf, atol=5e-2, rtol=5e-2), \
        "bf16-input mismatch vs reference"

    # --- test 4: small-batch auto fallback (fused XLA dot chain) ---------------
    out_small = linear_funnel_forward(x, packed_params, output_dim, pack=pack)
    out_small = jax.block_until_ready(out_small)
    assert jnp.allclose(out_small, ref, atol=1e-4, rtol=1e-4), "fallback mismatch"

    print("KERNEL_OK")
</pallas_src>

<mosaic_0001>
module attributes {stable_mosaic.version = 11 : i64} {
  func.func @kernel(%arg0: i32, %arg1: memref<16x128xf32, #tpu.memory_space<vmem>>, %arg2: memref<128x96xf32, #tpu.memory_space<vmem>>, %arg3: memref<1x96xf32, #tpu.memory_space<vmem>>, %arg4: memref<96x64xf32, #tpu.memory_space<vmem>>, %arg5: memref<1x64xf32, #tpu.memory_space<vmem>>, %arg6: memref<64x32xf32, #tpu.memory_space<vmem>>, %arg7: memref<1x32xf32, #tpu.memory_space<vmem>>, %arg8: memref<16x32xf32, #tpu.memory_space<vmem>>) attributes {dimension_semantics = [#tpu.dimension_semantics<parallel>], iteration_bounds = array<i64: 1>, scalar_prefetch = 0 : i64, scratch_operands = 0 : i64, tpu.core_type = #tpu.core_type<tc>, window_params = [{transform_indices = @transform_0, window_bounds = array<i64: 16, 128>}, {pipeline_mode = #tpu.pipeline_mode<synchronous>, transform_indices = @transform_1, window_bounds = array<i64: 128, 96>}, {pipeline_mode = #tpu.pipeline_mode<synchronous>, transform_indices = @transform_2, window_bounds = array<i64: 1, 96>}, {pipeline_mode = #tpu.pipeline_mode<synchronous>, transform_indices = @transform_3, window_bounds = array<i64: 96, 64>}, {pipeline_mode = #tpu.pipeline_mode<synchronous>, transform_indices = @transform_4, window_bounds = array<i64: 1, 64>}, {pipeline_mode = #tpu.pipeline_mode<synchronous>, transform_indices = @transform_5, window_bounds = array<i64: 64, 32>}, {pipeline_mode = #tpu.pipeline_mode<synchronous>, transform_indices = @transform_6, window_bounds = array<i64: 1, 32>}, {transform_indices = @transform_7, window_bounds = array<i64: 16, 32>}]} {
    %c0 = arith.constant 0 : index
    %c0_0 = arith.constant 0 : index
    %0 = vector.load %arg1[%c0, %c0_0] : memref<16x128xf32, #tpu.memory_space<vmem>>, vector<16x128xf32>
    %c0_1 = arith.constant 0 : index
    %c0_2 = arith.constant 0 : index
    %1 = vector.load %arg2[%c0_1, %c0_2] : memref<128x96xf32, #tpu.memory_space<vmem>>, vector<128x96xf32>
    %cst = arith.constant dense<0.000000e+00> : vector<16x96xf32>
    %2 = tpu.matmul %0, %1, %cst {dimension_numbers = #tpu.dot_dimension_numbers<[1], [0], [0], [1], [0, 0, 1, 1], [], []>} : vector<16x128xf32>, vector<128x96xf32>, vector<16x96xf32> -> vector<16x96xf32>
    %c0_3 = arith.constant 0 : index
    %c0_4 = arith.constant 0 : index
    %3 = vector.load %arg3[%c0_3, %c0_4] : memref<1x96xf32, #tpu.memory_space<vmem>>, vector<1x96xf32>
    %4 = vector.broadcast %3 : vector<1x96xf32> to vector<16x96xf32>
    %5 = arith.addf %2, %4 : vector<16x96xf32>
    %cst_5 = arith.constant 0.000000e+00 : f32
    %6 = vector.broadcast %cst_5 : f32 to vector<16x96xf32>
    %7 = arith.maximumf %5, %6 : vector<16x96xf32>
    %c0_6 = arith.constant 0 : index
    %c0_7 = arith.constant 0 : index
    %8 = vector.load %arg4[%c0_6, %c0_7] : memref<96x64xf32, #tpu.memory_space<vmem>>, vector<96x64xf32>
    %cst_8 = arith.constant dense<0.000000e+00> : vector<16x64xf32>
    %9 = tpu.matmul %7, %8, %cst_8 {dimension_numbers = #tpu.dot_dimension_numbers<[1], [0], [0], [1], [0, 0, 1, 1], [], []>} : vector<16x96xf32>, vector<96x64xf32>, vector<16x64xf32> -> vector<16x64xf32>
    %c0_9 = arith.constant 0 : index
    %c0_10 = arith.constant 0 : index
    %10 = vector.load %arg5[%c0_9, %c0_10] : memref<1x64xf32, #tpu.memory_space<vmem>>, vector<1x64xf32>
    %11 = vector.broadcast %10 : vector<1x64xf32> to vector<16x64xf32>
    %12 = arith.addf %9, %11 : vector<16x64xf32>
    %cst_11 = arith.constant 0.000000e+00 : f32
    %13 = vector.broadcast %cst_11 : f32 to vector<16x64xf32>
    %14 = arith.maximumf %12, %13 : vector<16x64xf32>
    %c0_12 = arith.constant 0 : index
    %c0_13 = arith.constant 0 : index
    %15 = vector.load %arg6[%c0_12, %c0_13] : memref<64x32xf32, #tpu.memory_space<vmem>>, vector<64x32xf32>
    %cst_14 = arith.constant dense<0.000000e+00> : vector<16x32xf32>
    %16 = tpu.matmul %14, %15, %cst_14 {dimension_numbers = #tpu.dot_dimension_numbers<[1], [0], [0], [1], [0, 0, 1, 1], [], []>} : vector<16x64xf32>, vector<64x32xf32>, vector<16x32xf32> -> vector<16x32xf32>
    %c0_15 = arith.constant 0 : index
    %c0_16 = arith.constant 0 : index
    %17 = vector.load %arg7[%c0_15, %c0_16] : memref<1x32xf32, #tpu.memory_space<vmem>>, vector<1x32xf32>
    %18 = vector.broadcast %17 : vector<1x32xf32> to vector<16x32xf32>
    %19 = arith.addf %16, %18 : vector<16x32xf32>
    %c0_17 = arith.constant 0 : index
    %c0_18 = arith.constant 0 : index
    %20 = vector.load %arg8[%c0_17, %c0_18] : memref<16x32xf32, #tpu.memory_space<vmem>>, vector<16x32xf32>
    tpu.vector_store %arg8[%c0_17, %c0_18], %19 {strides = array<i32>} : memref<16x32xf32, #tpu.memory_space<vmem>>, vector<16x32xf32>,
    return
  }
  func.func @transform_0(%arg0: i32) -> (i32, i32) {
    %c0_i32 = arith.constant 0 : i32
    %c0_i32_0 = arith.constant 0 : i32
    return %arg0, %c0_i32 : i32, i32
  }
  func.func @transform_1(%arg0: i32) -> (i32, i32) {
    %c0_i32 = arith.constant 0 : i32
    %c0_i32_0 = arith.constant 0 : i32
    %c0_i32_1 = arith.constant 0 : i32
    return %c0_i32, %c0_i32_0 : i32, i32
  }
  func.func @transform_2(%arg0: i32) -> (i32, i32) {
    %c0_i32 = arith.constant 0 : i32
    %c0_i32_0 = arith.constant 0 : i32
    %c0_i32_1 = arith.constant 0 : i32
    return %c0_i32, %c0_i32_0 : i32, i32
  }
  func.func @transform_3(%arg0: i32) -> (i32, i32) {
    %c0_i32 = arith.constant 0 : i32
    %c0_i32_0 = arith.constant 0 : i32
    %c0_i32_1 = arith.constant 0 : i32
    return %c0_i32, %c0_i32_0 : i32, i32
  }
  func.func @transform_4(%arg0: i32) -> (i32, i32) {
    %c0_i32 = arith.constant 0 : i32
    %c0_i32_0 = arith.constant 0 : i32
    %c0_i32_1 = arith.constant 0 : i32
    return %c0_i32, %c0_i32_0 : i32, i32
  }
  func.func @transform_5(%arg0: i32) -> (i32, i32) {
    %c0_i32 = arith.constant 0 : i32
    %c0_i32_0 = arith.constant 0 : i32
    %c0_i32_1 = arith.constant 0 : i32
    return %c0_i32, %c0_i32_0 : i32, i32
  }
  func.func @transform_6(%arg0: i32) -> (i32, i32) {
    %c0_i32 = arith.constant 0 : i32
    %c0_i32_0 = arith.constant 0 : i32
    %c0_i32_1 = arith.constant 0 : i32
    return %c0_i32, %c0_i32_0 : i32, i32
  }
  func.func @transform_7(%arg0: i32) -> (i32, i32) {
    %c0_i32 = arith.constant 0 : i32
    %c0_i32_0 = arith.constant 0 : i32
    return %arg0, %c0_i32 : i32, i32
  }
}

</mosaic_0001>

<bundles_post_ra>
// kernel: tpu_custom_call.1
= control target key start
LH: loop header
LB: loop body
LE: loop exit
PB: predicated region body
PF: predicated region fallthrough
CT: control target
= control target key end

     0   :  { %s755_s0 = inlined_call_operand.vmem [shape: f32[16,128], index: 0, kind: input, shape index: {}]   ;;  %s756_s1 = inlined_call_operand.vmem [shape: f32[128,96], index: 1, kind: input, shape index: {}]   ;;  %s757_s2 = inlined_call_operand.vmem [shape: f32[1,96], index: 2, kind: input, shape index: {}]   ;;  %s758_s3 = inlined_call_operand.vmem [shape: f32[96,64], index: 3, kind: input, shape index: {}]   ;;  %s759_s4 = inlined_call_operand.vmem [shape: f32[1,64], index: 4, kind: input, shape index: {}]   ;;  %s760_s5 = inlined_call_operand.vmem [shape: f32[64,32], index: 5, kind: input, shape index: {}]   ;;  %s761_s6 = inlined_call_operand.vmem [shape: f32[1,32], index: 6, kind: input, shape index: {}]   ;;  %s762_s7 = inlined_call_operand.hbm [shape: f32[16,32], index: 7, kind: output, shape index: {}]  }
   0x1   :  { %v29_v0 = vld [vmem:[%s756_s1] sm:$0xff]  ;;  %v30_v1 = vld [vmem:[%s756_s1 + $0x8] sm:$0xff]  ;;  %v31_v2 = vld [vmem:[%s756_s1 + $0x10] sm:$0xff] }
   0x2   :  { %v478_v3 = vpack.c.bf16 %v30_v1, %v29_v0  ;;  %v32_v4 = vld [vmem:[%s756_s1 + $0x18] sm:$0xff]  ;;  %v33_v6 = vld [vmem:[%s756_s1 + $0x20] sm:$0xff]  ;;  %v34_v7 = vld [vmem:[%s756_s1 + $0x28] sm:$0xff] }
   0x3   :  { %v482_v5 = vpack.c.bf16 %v32_v4, %v31_v2  ;;  %v486_v8 = vpack.c.bf16 %v34_v7, %v33_v6  ;;  %v35_v9 = vld [vmem:[%s756_s1 + $0x30] sm:$0xff]  ;;  %v36_v10 = vld [vmem:[%s756_s1 + $0x38] sm:$0xff]  ;;  %v27_v11 = vld [vmem:[%s755_s0] sm:$0xff] }
   0x4   :  { %479 = vmatprep.subr.bf16.mxu0 %v478_v3  ;;  %429 = vmatprep.mubr.f32.mxu0 %v27_v11  ;;  %v129_v12 = vld [vmem:[%s758_s3] sm:$0xff]  ;;  %v130_v13 = vld [vmem:[%s758_s3 + $0x8] sm:$0xff]  ;;  %v131_v14 = vld [vmem:[%s758_s3 + $0x10] sm:$0xff]  ;;  %v490_v20 = vpack.c.bf16 %v36_v10, %v35_v9 }
   0x5   :  { %481 = vmatpush3.bf16.msra.mxu0 %v478_v3  ;;  %v510_v15 = vpack.c.bf16 %v130_v13, %v129_v12  ;;  %v132_v16 = vld [vmem:[%s758_s3 + $0x18] sm:$0xff]  ;;  %v133_v18 = vld [vmem:[%s758_s3 + $0x20] sm:$0xff]  ;;  %v134_v19 = vld [vmem:[%s758_s3 + $0x28] sm:$0xff] }
   0x6   :  { %483 = vmatprep.subr.bf16.mxu0 %v482_v5  ;;  %v514_v17 = vpack.c.bf16 %v132_v16, %v131_v14 }
   0x7   :  { %511 = vmatprep.subr.bf16.mxu1 %v510_v15 }
   0x9   :  { %485 = vmatpush3.bf16.msra.mxu0 %v482_v5 }
   0xa   :  { %487 = vmatprep.subr.bf16.mxu0 %v486_v8 }
   0xb   :  { %12 = vsyncpa [#allocation3], 0  ;;  %v37_v21 = vld [vmem:[%s756_s1 + $0x40] sm:$0xff]  ;;  %v38_v22 = vld [vmem:[%s756_s1 + $0x48] sm:$0xff]  ;;  %513 = vmatpush3.bf16.msra.mxu1 %v510_v15  ;;  %v518_v23 = vpack.c.bf16 %v134_v19, %v133_v18  ;;  %vm148_vm0 = vcmask 785408   ;;  %vm247_vm1 = vcmask 523264  }
   0xc   :  { %515 = vmatprep.subr.bf16.mxu1 %v514_v17  ;;  %v135_v24 = vld [vmem:[%s758_s3 + $0x30] sm:$0xff]  ;;  %v136_v25 = vld [vmem:[%s758_s3 + $0x38] sm:$0xff]  ;;  %v494_v26 = vpack.c.bf16 %v38_v22, %v37_v21  ;;  %v137_v30 = vld [vmem:[%s758_s3 + $0x40] sm:$0xff]  ;;  %vm329_vm2 = vcmask 261120  }
   0xd   :  { %489 = vmatpush3.bf16.msra.mxu0 %v486_v8  ;;  %v39_v27 = vld [vmem:[%s756_s1 + $0x50] sm:$0xff]  ;;  %v40_v28 = vld [vmem:[%s756_s1 + $0x58] sm:$0xff]  ;;  %v522_v29 = vpack.c.bf16 %v136_v25, %v135_v24  ;;  %v138_v31 = vld [vmem:[%s758_s3 + $0x48] sm:$0xff] }
   0xe   :  { %491 = vmatprep.subr.bf16.mxu0 %v490_v20  ;;  %v498_v32 = vpack.c.bf16 %v40_v28, %v39_v27  ;;  %v41_v33 = vld [vmem:[%s756_s1 + $0x60] sm:$0xff]  ;;  %v42_v34 = vld [vmem:[%s756_s1 + $0x68] sm:$0xff]  ;;  %v526_v35 = vpack.c.bf16 %v138_v31, %v137_v30  ;;  %v43_v37 = vld [vmem:[%s756_s1 + $0x70] sm:$0xff] }
   0xf   :  { %517 = vmatpush3.bf16.msra.mxu1 %v514_v17  ;;  %v502_v36 = vpack.c.bf16 %v42_v34, %v41_v33  ;;  %v44_v38 = vld [vmem:[%s756_s1 + $0x78] sm:$0xff]  ;;  %v28_v40 = vld [vmem:[%s755_s0 + $0x8] sm:$0xff]  ;;  %v139_v41 = vld [vmem:[%s758_s3 + $0x50] sm:$0xff] }
  0x10   :  { %519 = vmatprep.subr.bf16.mxu1 %v518_v23  ;;  %v506_v39 = vpack.c.bf16 %v44_v38, %v43_v37  ;;  %v140_v42 = vld [vmem:[%s758_s3 + $0x58] sm:$0xff]  ;;  %v232_v44 = vld [vmem:[%s760_s5] sm:$0xff]  ;;  %v233_v45 = vld [vmem:[%s760_s5 + $0x8] sm:$0xff] }
  0x11   :  { %493 = vmatpush3.bf16.msra.mxu0 %v490_v20  ;;  %v530_v43 = vpack.c.bf16 %v140_v42, %v139_v41  ;;  %v534_v46 = vpack.c.bf16 %v233_v45, %v232_v44  ;;  %v348_v47 = vld [vmem:[%s757_s2] ss:$0 sm:$0xff]  ;;  %v234_v52 = vld [vmem:[%s760_s5 + $0x10] sm:$0xff]  ;;  %v235_v53 = vld [vmem:[%s760_s5 + $0x18] sm:$0xff] }
  0x12   :  { %495 = vmatprep.subr.bf16.mxu0 %v494_v26  ;;  %v538_v56 = vpack.c.bf16 %v235_v53, %v234_v52  ;;  %v236_v57 = vld [vmem:[%s760_s5 + $0x20] sm:$0xff]  ;;  %v237_v58 = vld [vmem:[%s760_s5 + $0x28] sm:$0xff]  ;;  %v238_v60 = vld [vmem:[%s760_s5 + $0x30] sm:$0xff] }
  0x13   :  { %521 = vmatpush3.bf16.msra.mxu1 %v518_v23  ;;  %v542_v59 = vpack.c.bf16 %v237_v58, %v236_v57  ;;  %v239_v61 = vld [vmem:[%s760_s5 + $0x38] sm:$0xff]  ;;  %v349_v63 = vld [vmem:[%s759_s4] ss:$0 sm:$0xff]  ;;  %s577_s5 = smov [#allocation2]  }
  0x14   :  { %523 = vmatprep.subr.bf16.mxu1 %v522_v29  ;;  %v546_v62 = vpack.c.bf16 %v239_v61, %v238_v60  ;;  %v352_v6 = vld [vmem:[%s761_s6] ss:$0 sm:$0xff]  ;;  %s337_s10 = sshll.u32 %s577_s5, 4  ;;  %s338_s10 = int_to_ptr.vmem [resolvable:$true] %s337_s10 }
  0x15   :  { %497 = vmatpush3.bf16.msra.mxu0 %v494_v26  ;;  %s553_s4 = scalar_lea.vmem %s338_s10, 256  ;;  %p558_p1 = scmp.lt.s32.totalorder %s338_s10, %s338_s10 }
  0x16   :  { %499 = vmatprep.subr.bf16.mxu0 %v498_v32  ;;  %p554_p0 = scmp.ne.s32.totalorder %s338_s10, %s553_s4  ;;  %p559_p2 = scmp.lt.s32.totalorder %s553_s4, %s553_s4 }
  0x17   :  { %525 = vmatpush3.bf16.msra.mxu1 %v522_v29 }
  0x18   :  { %527 = vmatprep.subr.bf16.mxu1 %v526_v35  ;;  %p560_p3 = por %p559_p2, %p558_p1 }
  0x19   :  { %501 = vmatpush3.bf16.msra.mxu0 %v498_v32 }
  0x1a   :  { %503 = vmatprep.subr.bf16.mxu0 %v502_v36  ;;  %p561_p4 = pnand %p560_p3, %p554_p0 }
  0x1b   :  { %529 = vmatpush3.bf16.msra.mxu1 %v526_v35 }
  0x1c   :  { %531 = vmatprep.subr.bf16.mxu1 %v530_v43 }
  0x1d   :  { %505 = vmatpush3.bf16.msra.mxu0 %v502_v36 }
  0x1e   :  { %507 = vmatprep.subr.bf16.mxu0 %v506_v39 }
  0x1f   :  { %533 = vmatpush3.bf16.msra.mxu1 %v530_v43 }
  0x20   :  { %535 = vmatprep.subr.bf16.mxu1 %v534_v46 }
  0x21   :  { %509 = vmatpush3.bf16.msra.mxu0 %v506_v39 }
  0x24   :  { %430 = vmatmul.mubr.f32.vlgmr.msra.gmra.mrb[0].mxu0 %v28_v40 }
  0xf7   :  { %v431_v48 = vpop.f32.mrb[0].mxu0 }
  0xf8   :  { %v124_v49 = vadd.f32 %v431_v48, %v348_v47  ;;  %v118_v50 = vpop.f32.mrb[1].mxu0 }
  0xf9   :  { %v119_v51 = vadd.f32 %v348_v47, %v118_v50 }
  0xfa   :  { %v128_v55 = vmax.f32 %v124_v49, 0.0 }
  0xfb   :  { %v127_v54 = vmax.f32 %v119_v51, 0.0 }
  0xfd   :  { %456 = vmatprep.mubr.msk.f32.mxu1 %vm148_vm0, %v127_v54 }
  0xfe   :  { %457 = vmatmul.mubr.msk.f32.vlgmr.msra.gmra.mrb[0].mxu1 %vm148_vm0, %v128_v55 }
  0xff   :  { %537 = vmatpush3.bf16.msra.mxu1 %v534_v46 }
 0x100   :  { %539 = vmatprep.subr.bf16.mxu1 %v538_v56 }
 0x103   :  { %541 = vmatpush3.bf16.msra.mxu1 %v538_v56 }
 0x104   :  { %543 = vmatprep.subr.bf16.mxu1 %v542_v59 }
 0x107   :  { %545 = vmatpush3.bf16.msra.mxu1 %v542_v59 }
 0x108   :  { %547 = vmatprep.subr.bf16.mxu1 %v546_v62 }
 0x10b   :  { %549 = vmatpush3.bf16.msra.mxu1 %v546_v62 }
 0x1d1   :  { %v458_v0 = vpop.f32.mrb[0].mxu1 }
 0x1d2   :  { %v227_v1 = vadd.f32 %v458_v0, %v349_v63  ;;  %v221_v2 = vpop.f32.mrb[1].mxu1 }
 0x1d3   :  { %v222_v3 = vadd.f32 %v349_v63, %v221_v2 }
 0x1d4   :  { %v231_v5 = vmax.f32 %v227_v1, 0.0 }
 0x1d5   :  { %v230_v4 = vmax.f32 %v222_v3, 0.0 }
 0x1d7   :  { %475 = vmatprep.mubr.msk.f32.mxu1 %vm247_vm1, %v230_v4 }
 0x1d8   :  { %476 = vmatmul.mubr.msk.f32.vlgmr.msra.gmra.mrb[2].mxu1 %vm247_vm1, %v231_v5 }
 0x2ab   :  { %v477_v7 = vpop.f32.mrb[2].mxu1 }
 0x2ac   :  { %v326_v8 = vadd.f32 %v477_v7, %v352_v6  ;;  %v320_v9 = vpop.f32.mrb[3].mxu1 }
 0x2ad   :  { %v321_v10 = vadd.f32 %v352_v6, %v320_v9 }
 0x2ae   :  { %331 = vst.msk [vmem:[#allocation2 + $0x8] sm:$0xff] %vm329_vm2, %v326_v8 }
 0x2af   :  { %330 = vst.msk [vmem:[#allocation2] sm:$0xff] %vm329_vm2, %v321_v10 }
 0x2b0   :  { %564 = shalt.err (!%p561_p4)
}
 0x2b1   :  { %s565_s6 = scalar_lea.hbm %s762_s7, 256 }
 0x2b2   :  { %p566_p5 = scmp.ne.s32.totalorder %s762_s7, %s565_s6  ;;  %p569_p6 = scmp.lt.u32.totalorder %s565_s6, %s762_s7 }
 0x2b4   :  { %p571_p7 = pnand %p569_p6, %p566_p5 }
 0x2b6   :  { %574 = shalt.err (!%p571_p7)
}
 0x2b7   :  { %s578_s16 = smov 128   ;;  %s579_s17 = smov 8  }
 0x2b8   :  { %343 = dma.vmem_to_hbm [thread:$0]  %s338_s10, 256, %s762_s7, [#allocation3], %s578_s16, %s578_s16, %s579_s17  }
 0x2b9   :  { %575 = dma.done.wait [#allocation3], 256  }
 0x2ba   :  { %576 = vsyncadd [#allocation3], 4294967040 }
 0x2bb   :  { %347 = vsyncpa [#allocation3], 1 }

</bundles_post_ra>
